<compile_context>
chip_gen: v6e
topology: v6e:2x2x1
jax: 0.10.0
libtpu: 0.0.40
codegen_flags: <defaults>
</compile_context>

<pallas_src>
import functools
import math

import jax
import jax.numpy as jnp
from jax.experimental import pallas as pl
from jax.experimental.pallas import tpu as pltpu

_LANE = 128  # vreg lane width


def _keep_mask(key, batch, keep_prob):
    """Per-sample 0/1 keep mask, matching torch: floor(keep_prob + U[0,1))."""
    u = jax.random.uniform(key, (batch,), dtype=jnp.float32)
    return jnp.floor(keep_prob + u)


@functools.lru_cache(maxsize=None)
def _vmem_budget():
    """(vmem_limit_bytes, per-buffer target bytes), generation aware."""
    try:
        cap = int(pltpu.get_tpu_info().vmem_capacity_bytes)
    except Exception:
        cap = 0
    if cap >= 96 * 1024 * 1024:                # v5e / v6e: 128 MiB physical VMEM
        return 64 * 1024 * 1024, 8 * 1024 * 1024
    return 32 * 1024 * 1024, 4 * 1024 * 1024   # v7x (64 MiB/TC) or unknown


def _choose_tiles(batch, feat, itemsize, target_bytes):
    """Pick (TB, TF) so one x block is ~target_bytes and lane/sublane aligned."""
    sub = {1: 32, 2: 16}.get(itemsize, 8)              # sublane packing unit
    target_elems = max(sub * _LANE, target_bytes // itemsize)

    # Minimum number of rows any block will carry (full batch if batch < sub).
    row_unit = batch if batch < sub else sub

    # Feature-axis tile: whole row if it fits, else the largest 128-multiple
    # within budget that divides feat (plain cap if no divisor is found).
    tf_cap_elems = max(_LANE, target_elems // max(1, row_unit))
    if feat <= tf_cap_elems:
        tf = feat
    else:
        cap = (tf_cap_elems // _LANE) * _LANE
        tf = cap
        q = feat // _LANE
        for d in range(cap // _LANE, 0, -1):
            if q % d == 0:
                tf = d * _LANE
                break

    # Batch-axis tile: fill the remaining element budget.
    tb_budget = max(1, target_elems // tf)
    if batch <= tb_budget:
        tb = batch
    else:
        tb = max(sub, (tb_budget // sub) * sub)
        for cand in range(tb, sub - 1, -sub):          # prefer a divisor of batch
            if batch % cand == 0:
                tb = cand
                break
        tb = min(tb, batch)                            # full-dim block is always legal

    # Best-effort even program count so v7x's two TensorCores stay balanced.
    gb, gf = -(-batch // tb), -(-feat // tf)
    if gb * gf > 1 and (gb * gf) % 2 == 1:
        if (tf > _LANE and (tf // 2) % _LANE == 0 and feat % (tf // 2) == 0
                and tb * (tf // 2) * itemsize >= (1 << 21)):
            tf //= 2
        elif (tb > sub and (tb // 2) % sub == 0 and batch % (tb // 2) == 0
                and (tb // 2) * tf * itemsize >= (1 << 21)):
            tb //= 2
    return tb, tf


def _drop_path_kernel(scale_ref, x_ref, o_ref):
    # scale_ref: VMEM (TB, 1) f32, already mask[b] / keep_prob
    # x_ref / o_ref: VMEM (TB, TF) tile of the flattened (batch, feat) tensor.
    # Multiply in x.dtype (matches torch's x.div(keep_prob) dtype semantics;
    # bf16 VALU on v6e/v7x is free, f32 inputs stay f32). Lane-broadcast of the
    # (TB, 1) scale over the TF lanes.
    o_ref[...] = x_ref[...] * scale_ref[...].astype(o_ref.dtype)


def drop_path_pallas(x, drop_prob=0.0, training=False, *, key=None,
                     donate_x=False, block_bytes=None):
    """Stochastic-depth forward. Always returns an array of x's shape/dtype.

    Fully traceable: wrap the caller in jax.jit so the tiny mask computation
    fuses with the surrounding graph instead of being a separate dispatch.

    TODO(synk): biggest system-level win is fusing this per-sample scale into
    the consumer residual add (y = x + drop_path(f(x))) instead of paying a
    full HBM read+write for one scalar multiply per sample.
    """
    if drop_prob == 0.0 or not training:
        return x
    if key is None:
        raise ValueError("drop_path_pallas needs a PRNG key in training mode")
    keep_prob = 1.0 - float(drop_prob)

    batch = x.shape[0]
    mask = _keep_mask(key, batch, keep_prob)             # f32 0/1 per sample
    scale = mask * jnp.float32(1.0 / keep_prob)          # 0 or 1/keep_prob

    feat = math.prod(x.shape[1:])

    if feat % _LANE != 0 or feat == 0:
        # Ragged feature count: one fused XLA broadcast multiply (pad + slice
        # through Pallas would ~3x HBM traffic for this bandwidth-bound op).
        s = scale.reshape((batch,) + (1,) * (x.ndim - 1)).astype(x.dtype)
        return x * s

    vmem_limit, target = _vmem_budget()
    if block_bytes is not None:
        target = int(block_bytes)

    itemsize = jnp.dtype(x.dtype).itemsize
    tb, tf = _choose_tiles(batch, feat, itemsize, target)
    grid = (pl.cdiv(batch, tb), pl.cdiv(feat, tf))

    x2 = x.reshape(batch, feat)        # free (bitcast) for a contiguous array
    scale2 = scale.reshape(batch, 1)

    out2 = pl.pallas_call(
        _drop_path_kernel,
        out_shape=jax.ShapeDtypeStruct((batch, feat), x.dtype),
        grid=grid,
        in_specs=[
            pl.BlockSpec((tb, 1), lambda bi, fi: (bi, 0)),     # per-sample scale
            pl.BlockSpec((tb, tf), lambda bi, fi: (bi, fi)),   # x tile
        ],
        out_specs=pl.BlockSpec((tb, tf), lambda bi, fi: (bi, fi)),
        compiler_params=pltpu.CompilerParams(
            dimension_semantics=("parallel", "parallel"),
            vmem_limit_bytes=vmem_limit,
        ),
        # x2 is input operand 1 (scale2 is operand 0). Aliasing is only safe
        # because x2 is a bitcast-reshape of contiguous x and the caller
        # promises not to reuse x afterwards.
        input_output_aliases=({1: 0} if donate_x else {}),
    )(scale2, x2)

    return out2.reshape(x.shape)


class DropPath:
    """JAX/Pallas equivalent of the PyTorch DropPath module (forward pass)."""

    def __init__(self, drop_prob=None):
        self.drop_prob = 0.0 if drop_prob is None else float(drop_prob)

    def __call__(self, x, training=False, key=None):
        return drop_path_pallas(x, self.drop_prob, training, key=key)


if __name__ == "__main__":
    root = jax.random.PRNGKey(0)
    k_x, k_mask = jax.random.split(root)

    drop_prob = 0.3
    keep_prob = 1.0 - drop_prob

    # --- training path, feat % 128 == 0 -> Pallas kernel (single block) ---
    x = jax.random.normal(k_x, (2, 4, 16, 16), dtype=jnp.float32)   # feat = 1024
    out = jax.block_until_ready(
        drop_path_pallas(x, drop_prob, training=True, key=k_mask))
    mask = _keep_mask(k_mask, x.shape[0], keep_prob)
    ref = x / keep_prob * mask.reshape(2, 1, 1, 1)
    assert out.shape == x.shape and out.dtype == x.dtype
    assert jnp.allclose(out, ref, atol=1e-5, rtol=1e-5)

    # --- batch-tiled multi-block grid (forced small block budget) ---
    xb = jax.random.normal(k_x, (16, 4, 16, 16), dtype=jnp.float32)  # feat = 1024
    outb = jax.block_until_ready(
        drop_path_pallas(xb, drop_prob, training=True, key=k_mask,
                         block_bytes=16 * 1024))                     # (2, 2) grid
    maskb = _keep_mask(k_mask, xb.shape[0], keep_prob)
    refb = xb / keep_prob * maskb.reshape(16, 1, 1, 1)
    assert jnp.allclose(outb, refb, atol=1e-5, rtol=1e-5)

    # --- feature-tiled multi-block grid (forced small block budget) ---
    xf = jax.random.normal(k_x, (4, 8, 32, 64), dtype=jnp.float32)   # feat = 16384
    outf = jax.block_until_ready(
        drop_path_pallas(xf, drop_prob, training=True, key=k_mask,
                         block_bytes=32 * 1024))                     # (1, 8) grid
    maskf = _keep_mask(k_mask, xf.shape[0], keep_prob)
    reff = xf / keep_prob * maskf.reshape(4, 1, 1, 1)
    assert jnp.allclose(outf, reff, atol=1e-5, rtol=1e-5)

    # --- ragged feature size -> fused XLA fallback path ---
    x_r = jax.random.normal(k_x, (2, 3, 5, 7), dtype=jnp.float32)    # feat = 105
    out_r = jax.block_until_ready(
        drop_path_pallas(x_r, drop_prob, training=True, key=k_mask))
    mask_r = _keep_mask(k_mask, x_r.shape[0], keep_prob)
    ref_r = x_r / keep_prob * mask_r.reshape(2, 1, 1, 1)
    assert out_r.shape == x_r.shape and out_r.dtype == x_r.dtype
    assert jnp.allclose(out_r, ref_r, atol=1e-5, rtol=1e-5)

    # --- bf16 input: multiply happens in bf16 (matches torch dtype semantics) ---
    x_bf = x.astype(jnp.bfloat16)
    out_bf = jax.block_until_ready(
        drop_path_pallas(x_bf, drop_prob, training=True, key=k_mask))
    ref_bf = (x_bf.astype(jnp.float32) / keep_prob
              * mask.reshape(2, 1, 1, 1)).astype(jnp.bfloat16)
    assert out_bf.dtype == jnp.bfloat16
    assert jnp.allclose(out_bf.astype(jnp.float32), ref_bf.astype(jnp.float32),
                        atol=2e-2, rtol=2e-2)

    # --- eval path / drop_prob == 0 must be identity ---
    mod = DropPath(drop_prob)
    y_eval = jax.block_until_ready(mod(x, training=False))
    assert jnp.array_equal(y_eval, x)
    mod0 = DropPath(0.0)
    y0 = jax.block_until_ready(mod0(x, training=True, key=k_mask))
    assert jnp.array_equal(y0, x)

    print("KERNEL_OK")
</pallas_src>

<mosaic_0001>
module attributes {stable_mosaic.version = 11 : i64} {
  func.func @_drop_path_kernel(%arg0: i32, %arg1: i32, %arg2: memref<2x1xf32, #tpu.memory_space<vmem>>, %arg3: memref<2x1024xf32, #tpu.memory_space<vmem>>, %arg4: memref<2x1024xf32, #tpu.memory_space<vmem>>) attributes {dimension_semantics = [#tpu.dimension_semantics<parallel>, #tpu.dimension_semantics<parallel>], iteration_bounds = array<i64: 1, 1>, scalar_prefetch = 0 : i64, scratch_operands = 0 : i64, tpu.core_type = #tpu.core_type<tc>, window_params = [{transform_indices = @transform_0, window_bounds = array<i64: 2, 1>}, {transform_indices = @transform_1, window_bounds = array<i64: 2, 1024>}, {transform_indices = @transform_2, window_bounds = array<i64: 2, 1024>}]} {
    %c0 = arith.constant 0 : index
    %c0_0 = arith.constant 0 : index
    %0 = vector.load %arg3[%c0, %c0_0] : memref<2x1024xf32, #tpu.memory_space<vmem>>, vector<2x1024xf32>
    %c0_1 = arith.constant 0 : index
    %c0_2 = arith.constant 0 : index
    %1 = vector.load %arg2[%c0_1, %c0_2] : memref<2x1xf32, #tpu.memory_space<vmem>>, vector<2x1xf32>
    %2 = vector.broadcast %1 : vector<2x1xf32> to vector<2x1024xf32>
    %3 = arith.mulf %0, %2 : vector<2x1024xf32>
    %c0_3 = arith.constant 0 : index
    %c0_4 = arith.constant 0 : index
    %4 = vector.load %arg4[%c0_3, %c0_4] : memref<2x1024xf32, #tpu.memory_space<vmem>>, vector<2x1024xf32>
    tpu.vector_store %arg4[%c0_3, %c0_4], %3 {strides = array<i32>} : memref<2x1024xf32, #tpu.memory_space<vmem>>, vector<2x1024xf32>,
    return
  }
  func.func @transform_0(%arg0: i32, %arg1: i32) -> (i32, i32) {
    %c0_i32 = arith.constant 0 : i32
    %c0_i32_0 = arith.constant 0 : i32
    return %arg0, %c0_i32 : i32, i32
  }
  func.func @transform_1(%arg0: i32, %arg1: i32) -> (i32, i32) {
    %c0_i32 = arith.constant 0 : i32
    return %arg0, %arg1 : i32, i32
  }
  func.func @transform_2(%arg0: i32, %arg1: i32) -> (i32, i32) {
    %c0_i32 = arith.constant 0 : i32
    return %arg0, %arg1 : i32, i32
  }
}

</mosaic_0001>

<bundles_post_ra>
// kernel: tpu_custom_call.1
= control target key start
LH: loop header
LB: loop body
LE: loop exit
PB: predicated region body
PF: predicated region fallthrough
CT: control target
= control target key end

     0   :  { %7 = vsyncpa [#allocation3], 0  ;;  %s135_s0 = inlined_call_operand.vmem [shape: f32[2,1], index: 0, kind: input, shape index: {}]   ;;  %s136_s1 = inlined_call_operand.hbm [shape: f32[2,1024], index: 1, kind: input, shape index: {}]   ;;  %s137_s2 = inlined_call_operand.hbm [shape: f32[2,1024], index: 2, kind: output, shape index: {}]  }
   0x1   :  { %8 = vsyncpa [#allocation4], 0  ;;  %s107_s9 = smov [#allocation2]  }
   0x2   :  { %s17_s10 = sshll.u32 %s107_s9, 4  ;;  %s18_s10 = int_to_ptr.vmem [resolvable:$true] %s17_s10 }
   0x3   :  { %s71_s11 = scalar_lea.vmem %s18_s10, 256  ;;  %p76_p1 = scmp.lt.s32.totalorder %s18_s10, %s18_s10 }
   0x4   :  { %p72_p0 = scmp.ne.s32.totalorder %s18_s10, %s71_s11  ;;  %p77_p2 = scmp.lt.s32.totalorder %s71_s11, %s71_s11 }
   0x6   :  { %p78_p3 = por %p77_p2, %p76_p1 }
   0x8   :  { %p79_p4 = pnand %p78_p3, %p72_p0 }
   0xa   :  { %82 = shalt.err (!%p79_p4)
}
   0xb   :  { %20 = dma.hbm_to_vmem [thread:$0]  %s136_s1, 256, %s18_s10, [#allocation3]  }
   0xc   :  { %103 = dma.done.wait [#allocation3], 256  }
   0xd   :  { %104 = vsyncadd [#allocation3], 4294967040  ;;  %v108_v0 = vmov 0   ;;  %v26_v1 = vld [vmem:[%s135_s0] sm:$0x3]  ;;  %v34_v4 = vlaneseq  ;;  %v25_v10 = vld [vmem:[#allocation2 + $0x8] sm:$0xff] }
   0xe   :  { %62 = vset.pattern.permute.xlu0 %v108_v0  ;;  %v109_v2 = vmov 269488144   ;;  %v24_v9 = vld [vmem:[#allocation2] sm:$0xff]  ;;  %s110_s16 = smov [#allocation5]  }
   0xf   :  { %29 = vperm.xlu0 %62, %v26_v1   ;;  %v32_v3 = vunpack.c.l.s4 %v109_v2  ;;  %v35_v6 = vshrl.u32 %v34_v4, 7  ;;  %s49_s1 = sshll.u32 %s110_s16, 4  ;;  %s50_s1 = int_to_ptr.vmem [resolvable:$true] %s49_s1 }
  0x10   :  { %s83_s17 = scalar_lea.vmem %s50_s1, 256  ;;  %p88_p6 = scmp.lt.s32.totalorder %s50_s1, %s50_s1 }
  0x11   :  { %v33_v5 = vunpack.c.0.s8 %v32_v3  ;;  %p84_p5 = scmp.ne.s32.totalorder %s50_s1, %s83_s17  ;;  %p89_p7 = scmp.lt.s32.totalorder %s83_s17, %s83_s17 }
  0x13   :  { %v36_v7 = vsub.s32 %v33_v5, %v35_v6  ;;  %p90_p8 = por %p89_p7, %p88_p6 }
  0x15   :  { %p91_p9 = pnand %p90_p8, %p84_p5 }
  0x8a   :  { %v30_v8 = vpop.permute.xlu0 %29 }
  0x8b   :  { %v37_v11 = vrot.slane %v30_v8, %v36_v7 }
  0x8d   :  { %v39_v12 = vmul.f32 %v37_v11, %v24_v9  ;;  %v40_v13 = vmul.f32 %v37_v11, %v25_v10 }
  0x8f   :  { %41 = vst [vmem:[#allocation5] sm:$0xff] %v39_v12  ;;  %42 = vst [vmem:[#allocation5 + $0x8] sm:$0xff] %v40_v13 }
  0x90   :  { %94 = shalt.err (!%p91_p9)
}
  0x91   :  { %52 = dma.vmem_to_hbm [thread:$0]  %s50_s1, 256, %s137_s2, [#allocation4]  }
  0x92   :  { %105 = dma.done.wait [#allocation4], 256  }
  0x93   :  { %106 = vsyncadd [#allocation4], 4294967040 }
  0x94   :  { %56 = vsyncpa [#allocation3], 1 }
  0x95   :  { %57 = vsyncpa [#allocation4], 1 }

</bundles_post_ra>
